<compile_context>
chip_gen: v6e
topology: v6e:2x2x1
jax: 0.10.0
libtpu: 0.0.40
codegen_flags: <defaults>
</compile_context>

<pallas_src>
import functools

import jax
import jax.numpy as jnp
from jax import lax
from jax.experimental import pallas as pl
from jax.experimental.pallas import tpu as pltpu


def _ceil_to(x, m):
    return ((x + m - 1) // m) * m


def _cdiv(a, b):
    return (a + b - 1) // b


def _gap_kernel(xr_ref, xi_ref, or_ref, oi_ref, accr_ref, acci_ref, *,
                tl, n_red, l_valid, inv_count):
    """Per-sub-row means of the real and imag slabs.

    grid = (row_tiles ["parallel"], reduction_chunks ["arbitrary"]).
    """
    if n_red == 1:
        # Single reduction chunk: reduce directly, no accumulator needed.
        or_ref[...] = jnp.sum(xr_ref[...], axis=1, keepdims=True) * inv_count
        oi_ref[...] = jnp.sum(xi_ref[...], axis=1, keepdims=True) * inv_count
        return

    k = pl.program_id(1)

    @pl.when(k == 0)
    def _init():
        accr_ref[...] = jnp.zeros_like(accr_ref)
        acci_ref[...] = jnp.zeros_like(acci_ref)

    xr = xr_ref[...]
    xi = xi_ref[...]
    if n_red * tl != l_valid:
        # Ragged final chunk: out-of-bounds lanes are undefined -> zero them.
        gcol = k * tl + lax.broadcasted_iota(jnp.int32, xr.shape, 1)
        keep = gcol < l_valid
        xr = jnp.where(keep, xr, 0.0)
        xi = jnp.where(keep, xi, 0.0)

    # Lane-dense fold (TL is a multiple of 128 on this path): pure VPU adds into a
    # single-vreg-wide accumulator; no per-chunk cross-lane reduction.
    pr = xr[:, 0:128]
    pi = xi[:, 0:128]
    for g in range(1, tl // 128):
        pr = pr + xr[:, g * 128:(g + 1) * 128]
        pi = pi + xi[:, g * 128:(g + 1) * 128]
    accr_ref[...] += pr
    acci_ref[...] += pi

    @pl.when(k == n_red - 1)
    def _finalize():
        or_ref[...] = jnp.sum(accr_ref[...], axis=1, keepdims=True) * inv_count
        oi_ref[...] = jnp.sum(acci_ref[...], axis=1, keepdims=True) * inv_count


def pseudo_complex_avg_pool2d(x_c):
    """complex (N, C, H, W) -> complex (N, C, 1, 1)."""
    # TODO(synk): only the default constructor path (AdaptiveAvgPool2d((1,1))) is
    # implemented; kernel_size=... / output_size != (1,1) variants are not.
    N, C, H, W = x_c.shape
    # TPU vector units have no complex dtype and lax.bitcast_convert_type rejects
    # complex, so one real/imag extraction pass is unavoidable; XLA fuses the two
    # element-wise extractions into a single read of x_c.  Everything below is
    # reshape-only (layout preserving, free).  complex128 would be computed in f32.
    real = jnp.real(x_c).astype(jnp.float32)
    imag = jnp.imag(x_c).astype(jnp.float32)

    R = N * C
    HW = H * W

    # Row-split factor F: splits each row's reduction into F independent sub-rows
    # (free reshape) so the "parallel" axis has extent >= 2 when N*C is tiny (keeps
    # both v7x TensorCores busy) and very long reductions get shorter.  Needs F | HW.
    F = 1
    if R < 16 and HW >= 1024:
        while (R * (F * 2) <= 256) and (HW % (F * 2) == 0) and (HW // (F * 2) >= 512):
            F *= 2
    R2 = R * F          # rows fed to the kernel
    L = HW // F         # per-sub-row reduction length (lane axis)

    xr = real.reshape(R2, L)
    xi = imag.reshape(R2, L)

    # Tile sizing: large lane-dense blocks, no input padding.  Two inputs of
    # (TR, TL) f32 => up to ~8 MiB streamed per grid step (double-buffered ~16 MiB).
    TL_MAX = 4096
    TR_MAX = 256
    if R2 <= 16:
        TR = R2                                        # full dim: exempt from 8-rule
    else:
        TR = min(TR_MAX, _ceil_to(_cdiv(R2, 2), 8))    # >= 2 row tiles when possible
    n_rows = _cdiv(R2, TR)

    if L <= TL_MAX:
        TL = L                                         # full dim: exempt from 128-rule
        n_red = 1
    else:
        TL = TL_MAX                                    # multiple of 128; tail masked in-kernel
        n_red = _cdiv(L, TL)

    grid = (n_rows, n_red)
    kernel = functools.partial(_gap_kernel, tl=TL, n_red=n_red, l_valid=L,
                               inv_count=float(1.0 / HW))

    in_blk = pl.BlockSpec((TR, TL), lambda i, k: (i, k))
    out_blk = pl.BlockSpec((TR, 1), lambda i, k: (i, 0))

    part_r, part_i = pl.pallas_call(
        kernel,
        out_shape=(jax.ShapeDtypeStruct((R2, 1), jnp.float32),
                   jax.ShapeDtypeStruct((R2, 1), jnp.float32)),
        grid=grid,
        in_specs=[in_blk, in_blk],
        out_specs=(out_blk, out_blk),
        scratch_shapes=[pltpu.VMEM((TR, 128), jnp.float32),
                        pltpu.VMEM((TR, 128), jnp.float32)],
        compiler_params=pltpu.CompilerParams(
            dimension_semantics=("parallel", "arbitrary"),
            vmem_limit_bytes=48 << 20),
        cost_estimate=pl.CostEstimate(flops=2 * R2 * L,
                                      transcendentals=0,
                                      bytes_accessed=2 * R2 * L * 4 + 2 * R2 * 4),
    )(xr, xi)

    # Combine the F per-sub-row partial means (tiny (R, F) arrays) and rebuild complex.
    mean_r = jnp.sum(part_r.reshape(R, F), axis=1)
    mean_i = jnp.sum(part_i.reshape(R, F), axis=1)
    return lax.complex(mean_r, mean_i).reshape(N, C, 1, 1)


def pseudo_complex_avg_pool2d_ref(x_c):
    # Averaging real/imag separately == averaging the complex values.
    return jnp.mean(x_c, axis=(2, 3), keepdims=True)


if __name__ == "__main__":
    key = jax.random.PRNGKey(0)
    kr, ki = jax.random.split(key)
    N, C, H, W = 2, 4, 16, 16
    real = jax.random.normal(kr, (N, C, H, W), jnp.float32)
    imag = jax.random.normal(ki, (N, C, H, W), jnp.float32)
    x = lax.complex(real, imag)  # complex64, like the PyTorch module expects

    out = jax.block_until_ready(pseudo_complex_avg_pool2d(x))
    ref = jax.block_until_ready(pseudo_complex_avg_pool2d_ref(x))

    assert out.shape == (N, C, 1, 1), out.shape
    assert out.dtype == jnp.complex64, out.dtype
    assert bool(jnp.allclose(out, ref, rtol=1e-5, atol=1e-5)), "mismatch vs JAX reference"
    print("KERNEL_OK")
</pallas_src>

<mosaic_0001>
module attributes {stable_mosaic.version = 11 : i64} {
  func.func @_gap_kernel(%arg0: i32, %arg1: i32, %arg2: memref<8x256xf32, #tpu.memory_space<vmem>>, %arg3: memref<8x256xf32, #tpu.memory_space<vmem>>, %arg4: memref<8x1xf32, #tpu.memory_space<vmem>>, %arg5: memref<8x1xf32, #tpu.memory_space<vmem>>, %arg6: memref<8x128xf32, #tpu.memory_space<vmem>>, %arg7: memref<8x128xf32, #tpu.memory_space<vmem>>) attributes {dimension_semantics = [#tpu.dimension_semantics<parallel>, #tpu.dimension_semantics<arbitrary>], iteration_bounds = array<i64: 1, 1>, scalar_prefetch = 0 : i64, scratch_operands = 2 : i64, tpu.core_type = #tpu.core_type<tc>, window_params = [{transform_indices = @transform_0, window_bounds = array<i64: 8, 256>}, {transform_indices = @transform_1, window_bounds = array<i64: 8, 256>}, {transform_indices = @transform_2, window_bounds = array<i64: 8, 1>}, {transform_indices = @transform_3, window_bounds = array<i64: 8, 1>}]} {
    %c0 = arith.constant 0 : index
    %c0_0 = arith.constant 0 : index
    %0 = vector.load %arg2[%c0, %c0_0] : memref<8x256xf32, #tpu.memory_space<vmem>>, vector<8x256xf32>
    %cst = arith.constant dense<0.000000e+00> : vector<8xf32>
    %1 = vector.multi_reduction <add>, %0, %cst [1] : vector<8x256xf32> to vector<8xf32>
    %2 = vector.shape_cast %1 : vector<8xf32> to vector<8x1xf32>
    %cst_1 = arith.constant 3.906250e-03 : f32
    %3 = vector.broadcast %cst_1 : f32 to vector<8x1xf32>
    %4 = arith.mulf %2, %3 : vector<8x1xf32>
    %c0_2 = arith.constant 0 : index
    %c0_3 = arith.constant 0 : index
    %5 = vector.load %arg4[%c0_2, %c0_3] : memref<8x1xf32, #tpu.memory_space<vmem>>, vector<8x1xf32>
    tpu.vector_store %arg4[%c0_2, %c0_3], %4 {strides = array<i32>} : memref<8x1xf32, #tpu.memory_space<vmem>>, vector<8x1xf32>,
    %c0_4 = arith.constant 0 : index
    %c0_5 = arith.constant 0 : index
    %6 = vector.load %arg3[%c0_4, %c0_5] : memref<8x256xf32, #tpu.memory_space<vmem>>, vector<8x256xf32>
    %cst_6 = arith.constant dense<0.000000e+00> : vector<8xf32>
    %7 = vector.multi_reduction <add>, %6, %cst_6 [1] : vector<8x256xf32> to vector<8xf32>
    %8 = vector.shape_cast %7 : vector<8xf32> to vector<8x1xf32>
    %cst_7 = arith.constant 3.906250e-03 : f32
    %9 = vector.broadcast %cst_7 : f32 to vector<8x1xf32>
    %10 = arith.mulf %8, %9 : vector<8x1xf32>
    %c0_8 = arith.constant 0 : index
    %c0_9 = arith.constant 0 : index
    %11 = vector.load %arg5[%c0_8, %c0_9] : memref<8x1xf32, #tpu.memory_space<vmem>>, vector<8x1xf32>
    tpu.vector_store %arg5[%c0_8, %c0_9], %10 {strides = array<i32>} : memref<8x1xf32, #tpu.memory_space<vmem>>, vector<8x1xf32>,
    return
  }
  func.func @transform_0(%arg0: i32, %arg1: i32) -> (i32, i32) {
    %c0_i32 = arith.constant 0 : i32
    return %arg0, %arg1 : i32, i32
  }
  func.func @transform_1(%arg0: i32, %arg1: i32) -> (i32, i32) {
    %c0_i32 = arith.constant 0 : i32
    return %arg0, %arg1 : i32, i32
  }
  func.func @transform_2(%arg0: i32, %arg1: i32) -> (i32, i32) {
    %c0_i32 = arith.constant 0 : i32
    %c0_i32_0 = arith.constant 0 : i32
    return %arg0, %c0_i32 : i32, i32
  }
  func.func @transform_3(%arg0: i32, %arg1: i32) -> (i32, i32) {
    %c0_i32 = arith.constant 0 : i32
    %c0_i32_0 = arith.constant 0 : i32
    return %arg0, %c0_i32 : i32, i32
  }
}

</mosaic_0001>

<bundles_post_ra>
// kernel: tpu_custom_call.1
= control target key start
LH: loop header
LB: loop body
LE: loop exit
PB: predicated region body
PF: predicated region fallthrough
CT: control target
= control target key end

     0   :  { %9 = vsyncpa [#allocation5], 0  ;;  %s142_s0 = inlined_call_operand.hbm [shape: f32[8,256], index: 0, kind: input, shape index: {}]   ;;  %s143_s1 = inlined_call_operand.hbm [shape: f32[8,256], index: 1, kind: input, shape index: {}]   ;;  %s144_s2 = inlined_call_operand.vmem [shape: f32[8,1], index: 2, kind: output, shape index: {0}]   ;;  %s145_s3 = inlined_call_operand.vmem [shape: f32[8,1], index: 3, kind: output, shape index: {1}]  }
   0x1   :  { %10 = vsyncpa [#allocation7], 0  ;;  %s108_s12 = smov [#allocation4]   ;;  %s109_s14 = smov [#allocation6]  }
   0x2   :  { %s17_s13 = sshll.u32 %s108_s12, 4  ;;  %s27_s15 = sshll.u32 %s109_s14, 4  ;;  %s18_s13 = int_to_ptr.vmem [resolvable:$true] %s17_s13  ;;  %s28_s15 = int_to_ptr.vmem [resolvable:$true] %s27_s15 }
   0x3   :  { %s72_s16 = scalar_lea.vmem %s18_s13, 256  ;;  %p77_p1 = scmp.lt.s32.totalorder %s18_s13, %s18_s13 }
   0x4   :  { %p73_p0 = scmp.ne.s32.totalorder %s18_s13, %s72_s16  ;;  %p78_p2 = scmp.lt.s32.totalorder %s72_s16, %s72_s16 }
   0x6   :  { %p79_p3 = por %p78_p2, %p77_p1 }
   0x8   :  { %p80_p4 = pnand %p79_p3, %p73_p0 }
   0xa   :  { %83 = shalt.err (!%p80_p4)
}
   0xb   :  { %20 = dma.hbm_to_vmem [thread:$0]  %s142_s0, 256, %s18_s13, [#allocation5]  }
   0xc   :  { %s92_s19 = scalar_lea.vmem %s28_s15, 256  ;;  %p97_p6 = scmp.lt.s32.totalorder %s28_s15, %s28_s15 }
   0xd   :  { %p93_p5 = scmp.ne.s32.totalorder %s28_s15, %s92_s19  ;;  %p98_p7 = scmp.lt.s32.totalorder %s92_s19, %s92_s19 }
   0xf   :  { %p99_p8 = por %p98_p7, %p97_p6 }
  0x11   :  { %p100_p9 = pnand %p99_p8, %p93_p5 }
  0x13   :  { %103 = shalt.err (!%p100_p9)
}
  0x14   :  { %30 = dma.hbm_to_vmem [thread:$0]  %s143_s1, 256, %s28_s15, [#allocation7]  }
  0x15   :  { %104 = dma.done.wait [#allocation5], 256  }
  0x16   :  { %105 = vsyncadd [#allocation5], 4294967040 }
  0x17   :  { %106 = dma.done.wait [#allocation7], 256  }
  0x18   :  { %107 = vsyncadd [#allocation7], 4294967040  ;;  %v37_v0 = vld [vmem:[#allocation4] sm:$0xff]  ;;  %v38_v1 = vld [vmem:[#allocation4 + $0x8] sm:$0xff]  ;;  %vm43_vm0 = vcmask 7168  }
  0x19   :  { %v45_v2 = vld [vmem:[#allocation6] sm:$0xff]  ;;  %v39_v3 = vadd.f32 %v38_v1, %v37_v0  ;;  %v46_v4 = vld [vmem:[#allocation6 + $0x8] sm:$0xff] }
  0x1a   :  { %v47_v5 = vadd.f32 %v46_v4, %v45_v2 }
  0x1b   :  { %40 = vadd.xlane.f32.xlu0 %v39_v3 }
  0x1f   :  { %48 = vadd.xlane.f32.xlu0 %v47_v5 }
  0xa4   :  { %v41_v6 = vpop.xlane.xlu0 %40 }
  0xa5   :  { %v42_v7 = vmul.f32 0.00390625, %v41_v6 }
  0xa7   :  { %44 = vst.msk [vmem:[%s144_s2] sm:$0xff] %vm43_vm0, %v42_v7 }
  0xa8   :  { %v49_v8 = vpop.xlane.xlu0 %48 }
  0xa9   :  { %v50_v9 = vmul.f32 0.00390625, %v49_v8 }
  0xab   :  { %51 = vst.msk [vmem:[%s145_s3] sm:$0xff] %vm43_vm0, %v50_v9 }
  0xac   :  { %60 = vsyncpa [#allocation5], 1 }
  0xad   :  { %61 = vsyncpa [#allocation7], 1 }

</bundles_post_ra>
